<compile_context>
chip_gen: v7x
topology: tpu7x:2x2x1
jax: 0.10.0
libtpu: 0.0.40
codegen_flags: <defaults>
</compile_context>

<pallas_src>
import jax
import jax.numpy as jnp
from jax import lax
from jax.experimental import pallas as pl
from jax.experimental.pallas import tpu as pltpu


def _round_up(x, m):
    return ((x + m - 1) // m) * m


def ggd_kernel(theta_ref, alpha_ref, t_ref, x_ref, a_ref, w_ref, b_ref,
               o_ref, h_acc):
    j = pl.program_id(1)

    @pl.when(j == 0)
    def _():
        h_acc[...] = jnp.zeros_like(h_acc)

    # Weighted sum of the K diffusion matrices for this (TM, TN) tile.  K is
    # small and static: unrolled scalar-weighted accumulation with theta in
    # SMEM, initialized from term 0 (saves the zeros+add pass); the *a
    # elementwise multiply is applied once at the end.
    K = t_ref.shape[0]
    q = theta_ref[0] * t_ref[0]
    for i in range(1, K):
        q = q + theta_ref[i] * t_ref[i]
    qa = q * a_ref[...]                                        # (TM, TN)

    # Graph propagation: accumulate (TM, TN) @ (TN, D_in_p) on the MXU.
    h_acc[...] += jnp.dot(qa, x_ref[...], preferred_element_type=jnp.float32)

    # Finalize once per row tile: fc layer + bias + PReLU.
    @pl.when(j == pl.num_programs(1) - 1)
    def _():
        # h @ W^T with W kept as (D_out_p, D_in_p): contract dim 1 with dim 1.
        z = lax.dot_general(h_acc[...], w_ref[...],
                            (((1,), (1,)), ((), ())),
                            preferred_element_type=jnp.float32)
        z = z + b_ref[...]
        alpha = alpha_ref[0]
        o_ref[...] = jnp.where(z > 0, z, alpha * z).astype(o_ref.dtype)


def ggd_forward(theta, t, x, a, w, b, alpha, *, tm=512, tn=512):
    """theta: (K,), t: (K,N,N), x: (N,D_in), a: (N,N), w: (D_out,D_in),
    b: (D_out,), alpha: () PReLU weight.  Returns (N, D_out) float32."""
    K = theta.shape[0]
    N, d_in = x.shape
    d_out = w.shape[0]

    # Lane-dense feature dims (multiples of 128).
    d_in_p = _round_up(d_in, 128)
    d_out_p = _round_up(d_out, 128)

    # (8,128)-aligned tiles, shrunk for small graphs.
    tm = min(tm, _round_up(N, 8))
    tn = min(tn, _round_up(N, 128))
    n_rows = _round_up(N, tm)
    n_cols = _round_up(N, tn)

    # Zero-pad operands (inert: padded rows/cols contribute nothing, and the
    # padded output region is sliced off below).
    t_p = jnp.pad(t, ((0, 0), (0, n_rows - N), (0, n_cols - N)))
    a_p = jnp.pad(a, ((0, n_rows - N), (0, n_cols - N)))
    x_p = jnp.pad(x, ((0, n_cols - N), (0, d_in_p - d_in)))
    w_p = jnp.pad(w, ((0, d_out_p - d_out), (0, d_in_p - d_in)))
    b_p = jnp.pad(b, (0, d_out_p - d_out)).reshape(1, d_out_p)
    theta_s = theta.astype(jnp.float32)
    alpha_s = jnp.asarray(alpha, jnp.float32).reshape(1)

    grid = (n_rows // tm, n_cols // tn)

    # VMEM budget: double-buffered streamed tiles + resident scratch/params.
    itemsize = 4
    step_bytes = (K * tm * tn + tm * tn + tn * d_in_p + tm * d_out_p) * itemsize
    fixed_bytes = (tm * d_in_p + d_out_p * d_in_p + d_out_p) * itemsize
    vmem_limit = int(min(64 << 20,
                         max(32 << 20, 2 * (step_bytes + fixed_bytes) + (8 << 20))))

    out_p = pl.pallas_call(
        ggd_kernel,
        out_shape=jax.ShapeDtypeStruct((n_rows, d_out_p), jnp.float32),
        grid_spec=pltpu.PrefetchScalarGridSpec(
            num_scalar_prefetch=0,
            grid=grid,
            in_specs=[
                pl.BlockSpec(memory_space=pltpu.SMEM),                  # theta (K,)
                pl.BlockSpec(memory_space=pltpu.SMEM),                  # alpha (1,)
                pl.BlockSpec((K, tm, tn), lambda i, j: (0, i, j)),      # t
                pl.BlockSpec((tn, d_in_p), lambda i, j: (j, 0)),        # x
                pl.BlockSpec((tm, tn), lambda i, j: (i, j)),            # a
                pl.BlockSpec((d_out_p, d_in_p), lambda i, j: (0, 0)),   # w
                pl.BlockSpec((1, d_out_p), lambda i, j: (0, 0)),        # b
            ],
            out_specs=pl.BlockSpec((tm, d_out_p), lambda i, j: (i, 0)),
            scratch_shapes=[pltpu.VMEM((tm, d_in_p), jnp.float32)],
        ),
        compiler_params=pltpu.CompilerParams(
            dimension_semantics=("parallel", "arbitrary"),
            vmem_limit_bytes=vmem_limit,
        ),
    )(theta_s, alpha_s, t_p, x_p, a_p, w_p, b_p)

    return out_p[:N, :d_out]


def ggd_reference(theta, t, x, a, w, b, alpha):
    q = jnp.einsum("k,kij->ij", theta, t)
    h = (q * a) @ x
    z = h @ w.T + b
    return jnp.where(z > 0, z, alpha * z)


def _make_inputs(K, N, d_in, d_out):
    k1, k2, k3, k4, k5, k6 = jax.random.split(jax.random.PRNGKey(0), 6)
    theta = jax.random.normal(k1, (K,), dtype=jnp.float32)
    t = jax.random.normal(k2, (K, N, N), dtype=jnp.float32)
    x = jax.random.normal(k3, (N, d_in), dtype=jnp.float32)
    a = jax.random.normal(k4, (N, N), dtype=jnp.float32)
    w = jax.random.normal(k5, (d_out, d_in), dtype=jnp.float32) * 0.1
    b = jax.random.normal(k6, (d_out,), dtype=jnp.float32) * 0.1
    alpha = jnp.asarray(0.25, dtype=jnp.float32)  # PReLU default init
    return theta, t, x, a, w, b, alpha


if __name__ == "__main__":
    # Small module-sized check (single grid step after padding).
    args = _make_inputs(K=4, N=8, d_in=16, d_out=32)
    out = jax.block_until_ready(ggd_forward(*args))
    ref = ggd_reference(*args)
    assert out.shape == (8, 32)
    assert jnp.allclose(out, ref, atol=1e-4, rtol=1e-4), "mismatch (small case)"

    # Multi-tile check exercising the accumulator + pl.when finalize across a
    # (2, 2) grid.
    args2 = _make_inputs(K=3, N=256, d_in=16, d_out=32)
    out2 = jax.block_until_ready(ggd_forward(*args2, tm=128, tn=128))
    ref2 = ggd_reference(*args2)
    assert out2.shape == (256, 32)
    rel_err = jnp.max(jnp.abs(out2 - ref2)) / jnp.max(jnp.abs(ref2))
    assert rel_err < 2e-2, f"mismatch (tiled case), rel_err={rel_err}"

    print("KERNEL_OK")
</pallas_src>

<mosaic_0001>
module attributes {stable_mosaic.version = 11 : i64} {
  func.func @ggd_kernel(%arg0: i32, %arg1: i32, %arg2: memref<4xf32, #tpu.memory_space<smem>>, %arg3: memref<1xf32, #tpu.memory_space<smem>>, %arg4: memref<4x8x128xf32, #tpu.memory_space<vmem>>, %arg5: memref<128x128xf32, #tpu.memory_space<vmem>>, %arg6: memref<8x128xf32, #tpu.memory_space<vmem>>, %arg7: memref<128x128xf32, #tpu.memory_space<vmem>>, %arg8: memref<1x128xf32, #tpu.memory_space<vmem>>, %arg9: memref<8x128xf32, #tpu.memory_space<vmem>>, %arg10: memref<8x128xf32, #tpu.memory_space<vmem>>) attributes {dimension_semantics = [#tpu.dimension_semantics<parallel>, #tpu.dimension_semantics<arbitrary>], iteration_bounds = array<i64: 1, 1>, scalar_prefetch = 0 : i64, scratch_operands = 1 : i64, tpu.core_type = #tpu.core_type<tc>, window_params = [{transform_indices = @transform_0, window_bounds = array<i64: 4>}, {transform_indices = @transform_1, window_bounds = array<i64: 1>}, {transform_indices = @transform_2, window_bounds = array<i64: 4, 8, 128>}, {transform_indices = @transform_3, window_bounds = array<i64: 128, 128>}, {transform_indices = @transform_4, window_bounds = array<i64: 8, 128>}, {pipeline_mode = #tpu.pipeline_mode<synchronous>, transform_indices = @transform_5, window_bounds = array<i64: 128, 128>}, {pipeline_mode = #tpu.pipeline_mode<synchronous>, transform_indices = @transform_6, window_bounds = array<i64: 1, 128>}, {transform_indices = @transform_7, window_bounds = array<i64: 8, 128>}]} {
    %c0_i32 = arith.constant 0 : i32
    %0 = arith.cmpi eq, %arg1, %c0_i32 : i32
    %1 = arith.extui %0 : i1 to i32
    %c0_i32_0 = arith.constant 0 : i32
    %2 = arith.cmpi ne, %1, %c0_i32_0 : i32
    scf.if %2 {
      %cst_23 = arith.constant 0.000000e+00 : f32
      %36 = vector.broadcast %cst_23 : f32 to vector<8x128xf32>
      %c0_24 = arith.constant 0 : index
      %c0_25 = arith.constant 0 : index
      %37 = vector.load %arg10[%c0_24, %c0_25] : memref<8x128xf32, #tpu.memory_space<vmem>>, vector<8x128xf32>
      tpu.vector_store %arg10[%c0_24, %c0_25], %36 {strides = array<i32>} : memref<8x128xf32, #tpu.memory_space<vmem>>, vector<8x128xf32>,
    } else {
    }
    %c0 = arith.constant 0 : index
    %3 = memref.load %arg2[%c0] : memref<4xf32, #tpu.memory_space<smem>>
    %c0_1 = arith.constant 0 : index
    %c0_2 = arith.constant 0 : index
    %c0_3 = arith.constant 0 : index
    %4 = vector.load %arg4[%c0_1, %c0_2, %c0_3] : memref<4x8x128xf32, #tpu.memory_space<vmem>>, vector<1x8x128xf32>
    %5 = vector.shape_cast %4 : vector<1x8x128xf32> to vector<8x128xf32>
    %6 = vector.broadcast %3 : f32 to vector<8x128xf32>
    %7 = arith.mulf %6, %5 : vector<8x128xf32>
    %c1 = arith.constant 1 : index
    %8 = memref.load %arg2[%c1] : memref<4xf32, #tpu.memory_space<smem>>
    %c1_4 = arith.constant 1 : index
    %c0_5 = arith.constant 0 : index
    %c0_6 = arith.constant 0 : index
    %9 = vector.load %arg4[%c1_4, %c0_5, %c0_6] : memref<4x8x128xf32, #tpu.memory_space<vmem>>, vector<1x8x128xf32>
    %10 = vector.shape_cast %9 : vector<1x8x128xf32> to vector<8x128xf32>
    %11 = vector.broadcast %8 : f32 to vector<8x128xf32>
    %12 = arith.mulf %11, %10 : vector<8x128xf32>
    %13 = arith.addf %7, %12 : vector<8x128xf32>
    %c2 = arith.constant 2 : index
    %14 = memref.load %arg2[%c2] : memref<4xf32, #tpu.memory_space<smem>>
    %c2_7 = arith.constant 2 : index
    %c0_8 = arith.constant 0 : index
    %c0_9 = arith.constant 0 : index
    %15 = vector.load %arg4[%c2_7, %c0_8, %c0_9] : memref<4x8x128xf32, #tpu.memory_space<vmem>>, vector<1x8x128xf32>
    %16 = vector.shape_cast %15 : vector<1x8x128xf32> to vector<8x128xf32>
    %17 = vector.broadcast %14 : f32 to vector<8x128xf32>
    %18 = arith.mulf %17, %16 : vector<8x128xf32>
    %19 = arith.addf %13, %18 : vector<8x128xf32>
    %c3 = arith.constant 3 : index
    %20 = memref.load %arg2[%c3] : memref<4xf32, #tpu.memory_space<smem>>
    %c3_10 = arith.constant 3 : index
    %c0_11 = arith.constant 0 : index
    %c0_12 = arith.constant 0 : index
    %21 = vector.load %arg4[%c3_10, %c0_11, %c0_12] : memref<4x8x128xf32, #tpu.memory_space<vmem>>, vector<1x8x128xf32>
    %22 = vector.shape_cast %21 : vector<1x8x128xf32> to vector<8x128xf32>
    %23 = vector.broadcast %20 : f32 to vector<8x128xf32>
    %24 = arith.mulf %23, %22 : vector<8x128xf32>
    %25 = arith.addf %19, %24 : vector<8x128xf32>
    %c0_13 = arith.constant 0 : index
    %c0_14 = arith.constant 0 : index
    %26 = vector.load %arg6[%c0_13, %c0_14] : memref<8x128xf32, #tpu.memory_space<vmem>>, vector<8x128xf32>
    %27 = arith.mulf %25, %26 : vector<8x128xf32>
    %c0_15 = arith.constant 0 : index
    %c0_16 = arith.constant 0 : index
    %28 = vector.load %arg10[%c0_15, %c0_16] : memref<8x128xf32, #tpu.memory_space<vmem>>, vector<8x128xf32>
    %c0_17 = arith.constant 0 : index
    %c0_18 = arith.constant 0 : index
    %29 = vector.load %arg5[%c0_17, %c0_18] : memref<128x128xf32, #tpu.memory_space<vmem>>, vector<128x128xf32>
    %cst = arith.constant dense<0.000000e+00> : vector<8x128xf32>
    %30 = tpu.matmul %27, %29, %cst {dimension_numbers = #tpu.dot_dimension_numbers<[1], [0], [0], [1], [0, 0, 1, 1], [], []>} : vector<8x128xf32>, vector<128x128xf32>, vector<8x128xf32> -> vector<8x128xf32>
    %31 = arith.addf %28, %30 : vector<8x128xf32>
    %c0_19 = arith.constant 0 : index
    %c0_20 = arith.constant 0 : index
    %32 = vector.load %arg10[%c0_19, %c0_20] : memref<8x128xf32, #tpu.memory_space<vmem>>, vector<8x128xf32>
    tpu.vector_store %arg10[%c0_19, %c0_20], %31 {strides = array<i32>} : memref<8x128xf32, #tpu.memory_space<vmem>>, vector<8x128xf32>,
    %c0_i32_21 = arith.constant 0 : i32
    %33 = arith.cmpi eq, %arg1, %c0_i32_21 : i32
    %34 = arith.extui %33 : i1 to i32
    %c0_i32_22 = arith.constant 0 : i32
    %35 = arith.cmpi ne, %34, %c0_i32_22 : i32
    scf.if %35 {
      %c0_23 = arith.constant 0 : index
      %c0_24 = arith.constant 0 : index
      %36 = vector.load %arg10[%c0_23, %c0_24] : memref<8x128xf32, #tpu.memory_space<vmem>>, vector<8x128xf32>
      %c0_25 = arith.constant 0 : index
      %c0_26 = arith.constant 0 : index
      %37 = vector.load %arg7[%c0_25, %c0_26] : memref<128x128xf32, #tpu.memory_space<vmem>>, vector<128x128xf32>
      %cst_27 = arith.constant dense<0.000000e+00> : vector<8x128xf32>
      %38 = tpu.matmul %36, %37, %cst_27 {dimension_numbers = #tpu.dot_dimension_numbers<[1], [1], [0], [0], [0, 0, 1, 0], [], []>} : vector<8x128xf32>, vector<128x128xf32>, vector<8x128xf32> -> vector<8x128xf32>
      %c0_28 = arith.constant 0 : index
      %c0_29 = arith.constant 0 : index
      %39 = vector.load %arg8[%c0_28, %c0_29] : memref<1x128xf32, #tpu.memory_space<vmem>>, vector<1x128xf32>
      %40 = vector.broadcast %39 : vector<1x128xf32> to vector<8x128xf32>
      %41 = arith.addf %38, %40 : vector<8x128xf32>
      %c0_30 = arith.constant 0 : index
      %42 = memref.load %arg3[%c0_30] : memref<1xf32, #tpu.memory_space<smem>>
      %cst_31 = arith.constant 0.000000e+00 : f32
      %43 = vector.broadcast %cst_31 : f32 to vector<8x128xf32>
      %44 = arith.cmpf ogt, %41, %43 : vector<8x128xf32>
      %45 = vector.broadcast %42 : f32 to vector<8x128xf32>
      %46 = arith.mulf %45, %41 : vector<8x128xf32>
      %47 = arith.select %44, %41, %46 : vector<8x128xi1>, vector<8x128xf32>
      %c0_32 = arith.constant 0 : index
      %c0_33 = arith.constant 0 : index
      %48 = vector.load %arg9[%c0_32, %c0_33] : memref<8x128xf32, #tpu.memory_space<vmem>>, vector<8x128xf32>
      tpu.vector_store %arg9[%c0_32, %c0_33], %47 {strides = array<i32>} : memref<8x128xf32, #tpu.memory_space<vmem>>, vector<8x128xf32>,
    } else {
    }
    return
  }
  func.func @transform_0(%arg0: i32, %arg1: i32) -> i32 {
    %c0_i32 = arith.constant 0 : i32
    %c0_i32_0 = arith.constant 0 : i32
    return %c0_i32 : i32
  }
  func.func @transform_1(%arg0: i32, %arg1: i32) -> i32 {
    %c0_i32 = arith.constant 0 : i32
    %c0_i32_0 = arith.constant 0 : i32
    return %c0_i32 : i32
  }
  func.func @transform_2(%arg0: i32, %arg1: i32) -> (i32, i32, i32) {
    %c0_i32 = arith.constant 0 : i32
    %c0_i32_0 = arith.constant 0 : i32
    return %c0_i32, %arg0, %arg1 : i32, i32, i32
  }
  func.func @transform_3(%arg0: i32, %arg1: i32) -> (i32, i32) {
    %c0_i32 = arith.constant 0 : i32
    %c0_i32_0 = arith.constant 0 : i32
    return %arg1, %c0_i32 : i32, i32
  }
  func.func @transform_4(%arg0: i32, %arg1: i32) -> (i32, i32) {
    %c0_i32 = arith.constant 0 : i32
    return %arg0, %arg1 : i32, i32
  }
  func.func @transform_5(%arg0: i32, %arg1: i32) -> (i32, i32) {
    %c0_i32 = arith.constant 0 : i32
    %c0_i32_0 = arith.constant 0 : i32
    %c0_i32_1 = arith.constant 0 : i32
    return %c0_i32, %c0_i32_0 : i32, i32
  }
  func.func @transform_6(%arg0: i32, %arg1: i32) -> (i32, i32) {
    %c0_i32 = arith.constant 0 : i32
    %c0_i32_0 = arith.constant 0 : i32
    %c0_i32_1 = arith.constant 0 : i32
    return %c0_i32, %c0_i32_0 : i32, i32
  }
  func.func @transform_7(%arg0: i32, %arg1: i32) -> (i32, i32) {
    %c0_i32 = arith.constant 0 : i32
    %c0_i32_0 = arith.constant 0 : i32
    return %arg0, %c0_i32 : i32, i32
  }
}

</mosaic_0001>

<bundles_post_ra>
// kernel: tpu_custom_call.1
= control target key start
LH: loop header
LB: loop body
LE: loop exit
PB: predicated region body
PF: predicated region fallthrough
CT: control target
= control target key end

     0   :  { %13 = vsyncpa [#allocation7], 0  ;;  %s742_s0 = inlined_call_operand.vmem [shape: f32[4], index: 0, kind: input, shape index: {}]   ;;  %s743_s1 = inlined_call_operand.<no memory space> [shape: f32[1], index: 1, kind: input, shape index: {}]   ;;  %s744_s2 = inlined_call_operand.hbm [shape: f32[4,8,128], index: 2, kind: input, shape index: {}]   ;;  %s745_s3 = inlined_call_operand.hbm [shape: f32[128,128], index: 3, kind: input, shape index: {}]   ;;  %s746_s4 = inlined_call_operand.vmem [shape: f32[8,128], index: 4, kind: input, shape index: {}]   ;;  %s747_s5 = inlined_call_operand.hbm [shape: f32[128,128], index: 5, kind: input, shape index: {}]   ;;  %s748_s6 = inlined_call_operand.vmem [shape: f32[1,128], index: 6, kind: input, shape index: {}]   ;;  %s749_s7 = inlined_call_operand.hbm [shape: f32[8,128], index: 7, kind: output, shape index: {}]  }
   0x1   :  { %14 = vsyncpa [#allocation5], 0 }
   0x2   :  { %15 = vsyncpa [#allocation10], 0 }
   0x3   :  { %16 = vsyncpa [#allocation6], 0  ;;  %s23_s26 = sshll.u32 %s742_s0, 4  ;;  %s594_s27 = smov [#allocation9]   ;;  %s24_s26 = int_to_ptr.vmem [resolvable:$true] %s23_s26 }
   0x4   :  { %s46_s28 = sshll.u32 %s594_s27, 4  ;;  %s486_s8 = scalar_lea.hbm %s745_s3, 2048  ;;  %s47_s28 = int_to_ptr.vmem [resolvable:$true] %s46_s28 }
   0x5   :  { %p487_p0 = scmp.ne.s32.totalorder %s745_s3, %s486_s8  ;;  %p490_p1 = scmp.lt.u32.totalorder %s486_s8, %s745_s3 }
   0x7   :  { %p492_p2 = pnand %p490_p1, %p487_p0 }
   0x9   :  { %495 = shalt.err (!%p492_p2)
}
   0xa   :  { %s496_s13 = scalar_lea.vmem %s47_s28, 2048  ;;  %p501_p4 = scmp.lt.s32.totalorder %s47_s28, %s47_s28 }
   0xb   :  { %p497_p3 = scmp.ne.s32.totalorder %s47_s28, %s496_s13  ;;  %p502_p5 = scmp.lt.s32.totalorder %s496_s13, %s496_s13 }
   0xd   :  { %p503_p6 = por %p502_p5, %p501_p4 }
   0xf   :  { %p504_p7 = pnand %p503_p6, %p497_p3 }
  0x11   :  { %507 = shalt.err (!%p504_p7)
}
  0x12   :  { %s595_s0 = smov 128   ;;  %s596_s14 = smov 8  }
  0x13   :  { %52 = dma.hbm_to_vmem [thread:$0]  %s745_s3, 2048, %s47_s28, [#allocation10], %s595_s0, %s595_s0, %s596_s14  }
  0x14   :  { %s508_s17 = scalar_lea.vmem %s24_s26, 16  ;;  %p513_p9 = scmp.lt.s32.totalorder %s24_s26, %s24_s26 }
  0x15   :  { %p509_p8 = scmp.ne.s32.totalorder %s24_s26, %s508_s17  ;;  %p514_p10 = scmp.lt.s32.totalorder %s508_s17, %s508_s17 }
  0x17   :  { %p515_p11 = por %p514_p10, %p513_p9 }
  0x19   :  { %p516_p12 = pnand %p515_p11, %p509_p8 }
  0x1b   :  { %519 = shalt.err (!%p516_p12)
}
  0x1c   :  { %s597_s18 = smov [#allocation4]   ;;  %s598_s19 = smov [#allocation8]  }
  0x1d   :  { %26 = dma.vmem_to_smem %s24_s26, 16, %s597_s18, [#allocation7]  }
  0x1e   :  { %s34_s20 = sshll.u32 %s598_s19, 4  ;;  %s599_s21 = smov [#allocation11]   ;;  %s35_s20 = int_to_ptr.vmem [resolvable:$true] %s34_s20 }
  0x1f   :  { %s60_s22 = sshll.u32 %s599_s21, 4  ;;  %s520_s3 = scalar_lea.hbm %s744_s2, 512  ;;  %s662_s22 = int_to_ptr.vmem [resolvable:$true] %s60_s22 }
  0x20   :  { %p521_p13 = scmp.ne.s32.totalorder %s744_s2, %s520_s3  ;;  %p524_p0 = scmp.lt.u32.totalorder %s520_s3, %s744_s2 }
  0x22   :  { %p526_p1 = pnand %p524_p0, %p521_p13 }
  0x24   :  { %529 = shalt.err (!%p526_p1)
}
  0x25   :  { %s530_s26 = scalar_lea.vmem %s35_s20, 512  ;;  %p535_p3 = scmp.lt.s32.totalorder %s35_s20, %s35_s20 }
  0x26   :  { %p531_p2 = scmp.ne.s32.totalorder %s35_s20, %s530_s26  ;;  %p536_p4 = scmp.lt.s32.totalorder %s530_s26, %s530_s26 }
  0x28   :  { %p537_p5 = por %p536_p4, %p535_p3 }
  0x2a   :  { %p538_p6 = pnand %p537_p5, %p531_p2 }
  0x2c   :  { %541 = shalt.err (!%p538_p6)
}
  0x2d   :  { %40 = dma.hbm_to_vmem [thread:$0]  %s744_s2, 512, %s35_s20, [#allocation5], %s595_s0, %s595_s0, %s596_s14  }
  0x2e   :  { %s542_s11 = scalar_lea.hbm %s747_s5, 2048 }
  0x2f   :  { %p543_p7 = scmp.ne.s32.totalorder %s747_s5, %s542_s11  ;;  %p546_p8 = scmp.lt.u32.totalorder %s542_s11, %s747_s5 }
  0x31   :  { %p548_p9 = pnand %p546_p8, %p543_p7 }
  0x33   :  { %551 = shalt.err (!%p548_p9)
}
  0x34   :  { %s552_s17 = scalar_lea.vmem %s662_s22, 2048  ;;  %p557_p11 = scmp.lt.s32.totalorder %s662_s22, %s662_s22 }
  0x35   :  { %p553_p10 = scmp.ne.s32.totalorder %s662_s22, %s552_s17  ;;  %p558_p12 = scmp.lt.s32.totalorder %s552_s17, %s552_s17 }
  0x37   :  { %p559_p13 = por %p558_p12, %p557_p11 }
  0x39   :  { %p560_p0 = pnand %p559_p13, %p553_p10 }
  0x3b   :  { %563 = shalt.err (!%p560_p0)
}
  0x3c   :  { %66 = dma.hbm_to_vmem [thread:$0]  %s747_s5, 2048, %s662_s22, [#allocation10], %s595_s0, %s595_s0, %s596_s14  }
  0x3d   :  { %586 = dma.done.wait [#allocation7], 16  }
  0x3e   :  { %587 = vsyncadd [#allocation7], 4294967280 }
  0x3f   :  { %588 = dma.done.wait [#allocation5], 512  }
  0x40   :  { %589 = vsyncadd [#allocation5], 4294966784 }
  0x41   :  { %590 = dma.done.wait [#allocation10], 4096  }
  0x42   :  { %591 = vsyncadd [#allocation10], 4294963200 }
  0x43   :  { %81 = sfence }
  0x44   :  { %v112_v0 = vld [vmem:[#allocation9] sm:$0xff]  ;;  %v113_v1 = vld [vmem:[#allocation9 + $0x8] sm:$0xff]  ;;  %v114_v2 = vld [vmem:[#allocation9 + $0x10] sm:$0xff]  ;;  %v600_v3 = vmov 0.0|0.0   ;;  %vm601_vm0 = vmmov 0   ;;  %v602_v6 = vmov 0.0  }
  0x45   :  { %428 = vmatprep.subr.bf16.mxu0 %v600_v3  ;;  %v429_v4 = vpack.c.bf16 %v113_v1, %v112_v0  ;;  %v115_v5 = vld [vmem:[#allocation9 + $0x18] sm:$0xff]  ;;  %390 = vmatprep.mubr.msk.f32.mxu0 %vm601_vm0, %v602_v6  ;;  %s87_s5 = sld [smem:[#allocation4]]  ;;  %s320_s0 = sld [smem:[#allocation4 + $0x1]]  ;;  %v116_v8 = vld [vmem:[#allocation9 + $0x20] sm:$0xff]  ;;  %v117_v9 = vld [vmem:[#allocation9 + $0x28] sm:$0xff] }
  0x46   :  { %452 = vmatprep.subr.bf16.mxu1 %v600_v3  ;;  %425 = vmatprep.mubr.msk.f32.mxu1 %vm601_vm0, %v602_v6  ;;  %v432_v7 = vpack.c.bf16 %v115_v5, %v114_v2  ;;  %v435_v10 = vpack.c.bf16 %v117_v9, %v116_v8  ;;  %s702_s14 = sld [smem:[#allocation4 + $0x2]]  ;;  %v204_v11 = vld [vmem:[#allocation11] sm:$0xff]  ;;  %v205_v12 = vld [vmem:[#allocation11 + $0x8] sm:$0xff]  ;;  %v118_v13 = vld [vmem:[#allocation9 + $0x30] sm:$0xff]  ;;  %s705_s19 = sld [smem:[#allocation4 + $0x3]]  ;;  %v299_v8 = vstv %s743_s1 }
  0x47   :  { %430 = vmatpush3.bf16.msra.mxu0 %v429_v4  ;;  %v119_v14 = vld [vmem:[#allocation9 + $0x38] sm:$0xff]  ;;  %v453_v15 = vpack.c.bf16 %v205_v12, %v204_v11  ;;  %v88_v16 = vld [vmem:[#allocation8] sm:$0xff]  ;;  %v93_v19 = vld [vmem:[#allocation8 + $0x8] sm:$0xff]  ;;  %s603_s3 = smov [#allocation12]  }
  0x48   :  { %431 = vmatprep.subr.bf16.mxu0 %v600_v3  ;;  %v438_v17 = vpack.c.bf16 %v119_v14, %v118_v13  ;;  %v206_v21 = vld [vmem:[#allocation11 + $0x10] sm:$0xff]  ;;  %v207_v22 = vld [vmem:[#allocation11 + $0x18] sm:$0xff]  ;;  %v120_v23 = vld [vmem:[#allocation9 + $0x40] sm:$0xff]  ;;  %s309_s25 = sshll.u32 %s603_s3, 4  ;;  %s310_s25 = int_to_ptr.vmem [resolvable:$true] %s309_s25 }
  0x49   :  { %454 = vmatpush3.bf16.xpose.msra.mxu1 %v453_v15  ;;  %v121_v24 = vld [vmem:[#allocation9 + $0x48] sm:$0xff]  ;;  %v456_v27 = vpack.c.bf16 %v207_v22, %v206_v21  ;;  %v99_v29 = vld [vmem:[#allocation8 + $0x10] sm:$0xff]  ;;  %v123_v32 = vld [vmem:[#allocation9 + $0x58] sm:$0xff]  ;;  %s564_s27 = scalar_lea.vmem %s310_s25, 128  ;;  %p569_p2 = scmp.lt.s32.totalorder %s310_s25, %s310_s25 }
  0x4a   :  { %455 = vmatprep.subr.bf16.mxu1 %v600_v3  ;;  %v441_v28 = vpack.c.bf16 %v121_v24, %v120_v23  ;;  %v122_v31 = vld [vmem:[#allocation9 + $0x50] sm:$0xff]  ;;  %v105_v36 = vld [vmem:[#allocation8 + $0x18] sm:$0xff]  ;;  %v208_v38 = vld [vmem:[#allocation11 + $0x20] sm:$0xff]  ;;  %p565_p1 = scmp.ne.s32.totalorder %s310_s25, %s564_s27  ;;  %p570_p3 = scmp.lt.s32.totalorder %s564_s27, %s564_s27 }
  0x4b   :  { %433 = vmatpush3.bf16.msra.mxu0 %v432_v7  ;;  %v89_v18 = vstv %s87_s5  ;;  %v94_v20 = vstv %s320_s0  ;;  %v444_v35 = vpack.c.bf16 %v123_v32, %v122_v31  ;;  %v209_v39 = vld [vmem:[#allocation11 + $0x28] sm:$0xff]  ;;  %v124_v40 = vld [vmem:[#allocation9 + $0x60] sm:$0xff]  ;;  %v126_v46 = vld [vmem:[#allocation9 + $0x70] sm:$0xff] }
  0x4c   :  { %434 = vmatprep.subr.bf16.mxu0 %v600_v3  ;;  %v90_v25 = vmul.f32 %v89_v18, %v88_v16  ;;  %v95_v26 = vmul.f32 %v94_v20, %v93_v19  ;;  %v100_v30 = vstv %s702_s14  ;;  %v106_v37 = vstv %s705_s19  ;;  %v125_v41 = vld [vmem:[#allocation9 + $0x68] sm:$0xff]  ;;  %v127_v47 = vld [vmem:[#allocation9 + $0x78] sm:$0xff]  ;;  %v109_v50 = vld [vmem:[%s746_s4] sm:$0xff]  ;;  %p571_p4 = por %p570_p3, %p569_p2 }
  0x4d   :  { %v101_v34 = vmul.f32 %v100_v30, %v99_v29  ;;  %v107_v43 = vmul.f32 %v106_v37, %v105_v36  ;;  %v459_v44 = vpack.c.bf16 %v209_v39, %v208_v38  ;;  %v447_v45 = vpack.c.bf16 %v125_v41, %v124_v40  ;;  %v210_v51 = vld [vmem:[#allocation11 + $0x30] sm:$0xff]  ;;  %v211_v52 = vld [vmem:[#allocation11 + $0x38] sm:$0xff]  ;;  %v212_v55 = vld [vmem:[#allocation11 + $0x40] sm:$0xff] }
  0x4e   :  { %v96_v33 = vadd.f32 %v95_v26, %v90_v25  ;;  %v450_v49 = vpack.c.bf16 %v127_v47, %v126_v46  ;;  %v462_v54 = vpack.c.bf16 %v211_v52, %v210_v51  ;;  %v213_v56 = vld [vmem:[#allocation11 + $0x48] sm:$0xff]  ;;  %v214_v58 = vld [vmem:[#allocation11 + $0x50] sm:$0xff]  ;;  %v215_v59 = vld [vmem:[#allocation11 + $0x58] sm:$0xff]  ;;  %p572_p5 = pnand %p571_p4, %p565_p1 }
  0x4f   :  { %436 = vmatpush3.bf16.msra.mxu0 %v435_v10  ;;  %v465_v57 = vpack.c.bf16 %v213_v56, %v212_v55  ;;  %v468_v60 = vpack.c.bf16 %v215_v59, %v214_v58  ;;  %v216_v61 = vld [vmem:[#allocation11 + $0x60] sm:$0xff]  ;;  %v217_v62 = vld [vmem:[#allocation11 + $0x68] sm:$0xff]  ;;  %v218_v0 = vld [vmem:[#allocation11 + $0x70] sm:$0xff] }
  0x50   :  { %437 = vmatprep.subr.bf16.mxu0 %v600_v3  ;;  %v102_v42 = vadd.f32 %v101_v34, %v96_v33  ;;  %v471_v63 = vpack.c.bf16 %v217_v62, %v216_v61  ;;  %v219_v1 = vld [vmem:[#allocation11 + $0x78] sm:$0xff]  ;;  %v323_v6 = vld [vmem:[%s748_s6] ss:$0 sm:$0xff] }
  0x51   :  { %457 = vmatpush3.bf16.xpose.msra.mxu1 %v456_v27  ;;  %v474_v2 = vpack.c.bf16 %v219_v1, %v218_v0 }
  0x52   :  { %458 = vmatprep.subr.bf16.mxu1 %v600_v3  ;;  %v108_v48 = vadd.f32 %v107_v43, %v102_v42 }
  0x53   :  { %439 = vmatpush3.bf16.msra.mxu0 %v438_v17 }
  0x54   :  { %440 = vmatprep.subr.bf16.mxu0 %v600_v3  ;;  %v110_v53 = vmul.f32 %v109_v50, %v108_v48 }
  0x57   :  { %442 = vmatpush3.bf16.msra.mxu0 %v441_v28 }
  0x58   :  { %443 = vmatprep.subr.bf16.mxu0 %v600_v3 }
  0x59   :  { %460 = vmatpush3.bf16.xpose.msra.mxu1 %v459_v44 }
  0x5a   :  { %461 = vmatprep.subr.bf16.mxu1 %v600_v3 }
  0x5b   :  { %445 = vmatpush3.bf16.msra.mxu0 %v444_v35 }
  0x5c   :  { %446 = vmatprep.subr.bf16.mxu0 %v600_v3 }
  0x5f   :  { %448 = vmatpush3.bf16.msra.mxu0 %v447_v45 }
  0x60   :  { %449 = vmatprep.subr.bf16.mxu0 %v600_v3 }
  0x61   :  { %463 = vmatpush3.bf16.xpose.msra.mxu1 %v462_v54 }
  0x62   :  { %464 = vmatprep.subr.bf16.mxu1 %v600_v3 }
  0x63   :  { %451 = vmatpush3.bf16.msra.mxu0 %v450_v49 }
  0x66   :  { %391 = vmatmul.mubr.f32.vlgmr.msra.gmra.mrb[0].mxu0 %v110_v53 }
  0x69   :  { %466 = vmatpush3.bf16.xpose.msra.mxu1 %v465_v57 }
  0x6a   :  { %467 = vmatprep.subr.bf16.mxu1 %v600_v3 }
  0x71   :  { %469 = vmatpush3.bf16.xpose.msra.mxu1 %v468_v60 }
  0x72   :  { %470 = vmatprep.subr.bf16.mxu1 %v600_v3 }
  0x79   :  { %472 = vmatpush3.bf16.xpose.msra.mxu1 %v471_v63 }
  0x7a   :  { %473 = vmatprep.subr.bf16.mxu1 %v600_v3 }
  0x81   :  { %475 = vmatpush3.bf16.xpose.msra.mxu1 %v474_v2 }
 0x139   :  { %v194_v4 = vpop.f32.mrb[0].mxu0 }
 0x13a   :  { %v392_v5 = vpop.f32.mrb[1].mxu0  ;;  %426 = vmatmul.mubr.f32.vlgmr.msra.gmra.mrb[0].mxu1 %v194_v4 }
 0x20d   :  { %v293_v7 = vpop.f32.mrb[0].mxu1 }
 0x20e   :  { %v294_v9 = vadd.f32 %v323_v6, %v293_v7  ;;  %v427_v10 = vpop.f32.mrb[1].mxu1 }
 0x210   :  { %v300_v3 = vmul.f32 %v299_v8, %v294_v9  ;;  %vm298_vm1 = vcmp.gt.f32.partialorder %v294_v9, 0.0 }
 0x212   :  { %v301_v11 = vsel %vm298_vm1, %v294_v9, %v300_v3 }
 0x213   :  { %302 = vst [vmem:[#allocation12] sm:$0xff] %v301_v11 }
 0x214   :  { %575 = shalt.err (!%p572_p5)
}
 0x215   :  { %s576_s1 = scalar_lea.hbm %s749_s7, 128 }
 0x216   :  { %p577_p6 = scmp.ne.s32.totalorder %s749_s7, %s576_s1  ;;  %p580_p7 = scmp.lt.u32.totalorder %s576_s1, %s749_s7 }
 0x218   :  { %p582_p8 = pnand %p580_p7, %p577_p6 }
 0x21a   :  { %585 = shalt.err (!%p582_p8)
}
 0x21b   :  { %312 = dma.vmem_to_hbm [thread:$0]  %s310_s25, 128, %s749_s7, [#allocation6]  }
 0x21c   :  { %592 = dma.done.wait [#allocation6], 128  }
 0x21d   :  { %593 = vsyncadd [#allocation6], 4294967168 }
 0x21e   :  { %316 = vsyncpa [#allocation5], 1 }
 0x21f   :  { %317 = vsyncpa [#allocation10], 1 }
 0x220   :  { %318 = vsyncpa [#allocation6], 1 }
 0x221   :  { %319 = vsyncpa [#allocation7], 1 }

</bundles_post_ra>
